<compile_context>
chip_gen: v6e
topology: v6e:2x2x1
jax: 0.10.0
libtpu: 0.0.40
codegen_flags: <defaults>
</compile_context>

<pallas_src>
import math

import jax
import jax.numpy as jnp
from jax import lax
from jax.experimental import pallas as pl
from jax.experimental.pallas import tpu as pltpu


def flow1d_kernel(mus_ref, a_ref, half_w_ref, coef_ref, x_ref, z_ref, dz_ref):
    """z = 0.5 + sum_k half_w_k*erf(u_k),  dz/dx = sum_k coef_k*exp(-u_k^2),
    with u_k = (x - mu_k) * a_k, a_k = 1/(sigma_k*sqrt(2))."""
    x = x_ref[...]                          # (TR, 128) f32 tile
    s = jnp.zeros_like(x)
    dz = jnp.zeros_like(x)
    n_components = mus_ref.shape[0]
    for k in range(n_components):           # static unroll over mixture components
        u = (x - mus_ref[k]) * a_ref[k]
        s = s + half_w_ref[k] * lax.erf(u)   # EUP/VALU; no per-element divide
        dz = dz + coef_ref[k] * jnp.exp(-(u * u))
    z_ref[...] = s + jnp.float32(0.5)
    dz_ref[...] = dz


def flow1d_forward(x, mus, log_sigmas, weight_logits, *, max_tile_rows=512, lanes=128):
    """Matches torch Flow1d.forward: returns (z, dz_by_dx), each of shape (N,)."""
    x_flat = x.reshape(-1).astype(jnp.float32)
    n = x_flat.shape[0]

    # Choose tiling: rows of 128 lanes, tile_rows a multiple of 8, pad only if needed.
    rows_needed = -(-n // lanes)
    rows8 = -(-rows_needed // 8) * 8
    tile_rows = min(max_tile_rows, rows8)
    rows = -(-rows8 // tile_rows) * tile_rows
    pad = rows * lanes - n
    if pad:
        x_flat = jnp.pad(x_flat, (0, pad))
    x2 = x_flat.reshape(rows, lanes)

    # Tiny parameter transforms stay in plain JAX (glue); precompute per-component
    # scalars so the kernel's k-loop is mul/add/erf/exp only.
    mus_f = mus.astype(jnp.float32)
    sigmas = jnp.exp(log_sigmas.astype(jnp.float32))
    weights = jax.nn.softmax(weight_logits.astype(jnp.float32))
    a = 1.0 / (sigmas * jnp.float32(math.sqrt(2.0)))              # 1/(sigma*sqrt(2))
    half_w = jnp.float32(0.5) * weights                            # 0.5*w
    coef = weights / (sigmas * jnp.float32(math.sqrt(2.0 * math.pi)))  # w/(sigma*sqrt(2pi))

    n_components = mus_f.shape[0]
    n_elems = rows * lanes
    cost = pl.CostEstimate(
        flops=int(n_elems) * int(n_components) * 7,
        transcendentals=int(n_elems) * int(n_components) * 2,
        bytes_accessed=int(n_elems) * 12,
    )

    grid = (rows // tile_rows,)
    z2, dz2 = pl.pallas_call(
        flow1d_kernel,
        out_shape=(
            jax.ShapeDtypeStruct((rows, lanes), jnp.float32),
            jax.ShapeDtypeStruct((rows, lanes), jnp.float32),
        ),
        grid=grid,
        in_specs=[
            pl.BlockSpec(memory_space=pltpu.MemorySpace.SMEM),   # mus (K,)
            pl.BlockSpec(memory_space=pltpu.MemorySpace.SMEM),   # a = 1/(sigma*sqrt2) (K,)
            pl.BlockSpec(memory_space=pltpu.MemorySpace.SMEM),   # 0.5*w (K,)
            pl.BlockSpec(memory_space=pltpu.MemorySpace.SMEM),   # w/(sigma*sqrt(2pi)) (K,)
            pl.BlockSpec((tile_rows, lanes), lambda i: (i, 0)),  # x tile
        ],
        out_specs=(
            pl.BlockSpec((tile_rows, lanes), lambda i: (i, 0)),
            pl.BlockSpec((tile_rows, lanes), lambda i: (i, 0)),
        ),
        compiler_params=pltpu.CompilerParams(
            dimension_semantics=("parallel",),
        ),
        cost_estimate=cost,
    )(mus_f, a, half_w, coef, x2)

    z = z2.reshape(-1)
    dz = dz2.reshape(-1)
    if pad:
        z = z[:n]
        dz = dz[:n]
    return z, dz


def flow1d_reference(x, mus, log_sigmas, weight_logits):
    """Pure-JAX reference mirroring the PyTorch forward exactly."""
    x = x.reshape(-1, 1).astype(jnp.float32)                    # (N, 1)
    weights = jax.nn.softmax(weight_logits).reshape(1, -1)      # (1, K)
    sigmas = jnp.exp(log_sigmas)
    t = (x - mus) / sigmas
    cdf = 0.5 * (1.0 + lax.erf(t / jnp.sqrt(2.0)))
    pdf = jnp.exp(-0.5 * t * t) / (sigmas * jnp.sqrt(2.0 * jnp.pi))
    z = (cdf * weights).sum(axis=1)
    dz = (pdf * weights).sum(axis=1)
    return z, dz


if __name__ == "__main__":
    key = jax.random.PRNGKey(0)
    k_mu, k_x = jax.random.split(key)

    n_components = 4
    # Deterministic parameter init matching the module's __init__ shapes:
    #   mus ~ randn(K), log_sigmas = zeros(K), weight_logits = ones(K)
    mus = jax.random.normal(k_mu, (n_components,), dtype=jnp.float32)
    log_sigmas = jnp.zeros((n_components,), dtype=jnp.float32)
    weight_logits = jnp.ones((n_components,), dtype=jnp.float32)

    # Small input; the module flattens everything to (-1, 1) anyway.
    x = jax.random.normal(k_x, (2, 4, 16, 16), dtype=jnp.float32)

    z, dz = flow1d_forward(x, mus, log_sigmas, weight_logits)
    z = jax.block_until_ready(z)
    dz = jax.block_until_ready(dz)

    z_ref, dz_ref = flow1d_reference(x, mus, log_sigmas, weight_logits)
    assert z.shape == (x.size,) and dz.shape == (x.size,)
    assert jnp.allclose(z, z_ref, atol=1e-5, rtol=1e-5)
    assert jnp.allclose(dz, dz_ref, atol=1e-5, rtol=1e-5)

    print("KERNEL_OK")
</pallas_src>

<mosaic_0001>
module attributes {stable_mosaic.version = 11 : i64} {
  func.func @flow1d_kernel(%arg0: i32, %arg1: memref<4xf32, #tpu.memory_space<smem>>, %arg2: memref<4xf32, #tpu.memory_space<smem>>, %arg3: memref<4xf32, #tpu.memory_space<smem>>, %arg4: memref<4xf32, #tpu.memory_space<smem>>, %arg5: memref<16x128xf32, #tpu.memory_space<vmem>>, %arg6: memref<16x128xf32, #tpu.memory_space<vmem>>, %arg7: memref<16x128xf32, #tpu.memory_space<vmem>>) attributes {dimension_semantics = [#tpu.dimension_semantics<parallel>], iteration_bounds = array<i64: 1>, scalar_prefetch = 0 : i64, scratch_operands = 0 : i64, tpu.core_type = #tpu.core_type<tc>, window_params = [{transform_indices = @transform_0, window_bounds = array<i64: 4>}, {transform_indices = @transform_1, window_bounds = array<i64: 4>}, {transform_indices = @transform_2, window_bounds = array<i64: 4>}, {transform_indices = @transform_3, window_bounds = array<i64: 4>}, {transform_indices = @transform_4, window_bounds = array<i64: 16, 128>}, {transform_indices = @transform_5, window_bounds = array<i64: 16, 128>}, {transform_indices = @transform_6, window_bounds = array<i64: 16, 128>}]} {
    %c0 = arith.constant 0 : index
    %c0_0 = arith.constant 0 : index
    %0 = vector.load %arg5[%c0, %c0_0] : memref<16x128xf32, #tpu.memory_space<vmem>>, vector<16x128xf32>
    %cst = arith.constant 0.000000e+00 : f32
    %1 = vector.broadcast %cst : f32 to vector<16x128xf32>
    %cst_1 = arith.constant 0.000000e+00 : f32
    %2 = vector.broadcast %cst_1 : f32 to vector<16x128xf32>
    %c0_2 = arith.constant 0 : index
    %3 = memref.load %arg1[%c0_2] : memref<4xf32, #tpu.memory_space<smem>>
    %4 = vector.broadcast %3 : f32 to vector<16x128xf32>
    %5 = arith.subf %0, %4 : vector<16x128xf32>
    %c0_3 = arith.constant 0 : index
    %6 = memref.load %arg2[%c0_3] : memref<4xf32, #tpu.memory_space<smem>>
    %7 = vector.broadcast %6 : f32 to vector<16x128xf32>
    %8 = arith.mulf %5, %7 : vector<16x128xf32>
    %c0_4 = arith.constant 0 : index
    %9 = memref.load %arg3[%c0_4] : memref<4xf32, #tpu.memory_space<smem>>
    %10 = math.erf %8 : vector<16x128xf32>
    %11 = vector.broadcast %9 : f32 to vector<16x128xf32>
    %12 = arith.mulf %11, %10 : vector<16x128xf32>
    %13 = arith.addf %1, %12 : vector<16x128xf32>
    %c0_5 = arith.constant 0 : index
    %14 = memref.load %arg4[%c0_5] : memref<4xf32, #tpu.memory_space<smem>>
    %15 = arith.mulf %8, %8 : vector<16x128xf32>
    %cst_6 = arith.constant 0.000000e+00 : f32
    %16 = vector.broadcast %cst_6 : f32 to vector<16x128xf32>
    %17 = arith.subf %16, %15 : vector<16x128xf32>
    %18 = math.exp %17 : vector<16x128xf32>
    %19 = vector.broadcast %14 : f32 to vector<16x128xf32>
    %20 = arith.mulf %19, %18 : vector<16x128xf32>
    %21 = arith.addf %2, %20 : vector<16x128xf32>
    %c1 = arith.constant 1 : index
    %22 = memref.load %arg1[%c1] : memref<4xf32, #tpu.memory_space<smem>>
    %23 = vector.broadcast %22 : f32 to vector<16x128xf32>
    %24 = arith.subf %0, %23 : vector<16x128xf32>
    %c1_7 = arith.constant 1 : index
    %25 = memref.load %arg2[%c1_7] : memref<4xf32, #tpu.memory_space<smem>>
    %26 = vector.broadcast %25 : f32 to vector<16x128xf32>
    %27 = arith.mulf %24, %26 : vector<16x128xf32>
    %c1_8 = arith.constant 1 : index
    %28 = memref.load %arg3[%c1_8] : memref<4xf32, #tpu.memory_space<smem>>
    %29 = math.erf %27 : vector<16x128xf32>
    %30 = vector.broadcast %28 : f32 to vector<16x128xf32>
    %31 = arith.mulf %30, %29 : vector<16x128xf32>
    %32 = arith.addf %13, %31 : vector<16x128xf32>
    %c1_9 = arith.constant 1 : index
    %33 = memref.load %arg4[%c1_9] : memref<4xf32, #tpu.memory_space<smem>>
    %34 = arith.mulf %27, %27 : vector<16x128xf32>
    %cst_10 = arith.constant 0.000000e+00 : f32
    %35 = vector.broadcast %cst_10 : f32 to vector<16x128xf32>
    %36 = arith.subf %35, %34 : vector<16x128xf32>
    %37 = math.exp %36 : vector<16x128xf32>
    %38 = vector.broadcast %33 : f32 to vector<16x128xf32>
    %39 = arith.mulf %38, %37 : vector<16x128xf32>
    %40 = arith.addf %21, %39 : vector<16x128xf32>
    %c2 = arith.constant 2 : index
    %41 = memref.load %arg1[%c2] : memref<4xf32, #tpu.memory_space<smem>>
    %42 = vector.broadcast %41 : f32 to vector<16x128xf32>
    %43 = arith.subf %0, %42 : vector<16x128xf32>
    %c2_11 = arith.constant 2 : index
    %44 = memref.load %arg2[%c2_11] : memref<4xf32, #tpu.memory_space<smem>>
    %45 = vector.broadcast %44 : f32 to vector<16x128xf32>
    %46 = arith.mulf %43, %45 : vector<16x128xf32>
    %c2_12 = arith.constant 2 : index
    %47 = memref.load %arg3[%c2_12] : memref<4xf32, #tpu.memory_space<smem>>
    %48 = math.erf %46 : vector<16x128xf32>
    %49 = vector.broadcast %47 : f32 to vector<16x128xf32>
    %50 = arith.mulf %49, %48 : vector<16x128xf32>
    %51 = arith.addf %32, %50 : vector<16x128xf32>
    %c2_13 = arith.constant 2 : index
    %52 = memref.load %arg4[%c2_13] : memref<4xf32, #tpu.memory_space<smem>>
    %53 = arith.mulf %46, %46 : vector<16x128xf32>
    %cst_14 = arith.constant 0.000000e+00 : f32
    %54 = vector.broadcast %cst_14 : f32 to vector<16x128xf32>
    %55 = arith.subf %54, %53 : vector<16x128xf32>
    %56 = math.exp %55 : vector<16x128xf32>
    %57 = vector.broadcast %52 : f32 to vector<16x128xf32>
    %58 = arith.mulf %57, %56 : vector<16x128xf32>
    %59 = arith.addf %40, %58 : vector<16x128xf32>
    %c3 = arith.constant 3 : index
    %60 = memref.load %arg1[%c3] : memref<4xf32, #tpu.memory_space<smem>>
    %61 = vector.broadcast %60 : f32 to vector<16x128xf32>
    %62 = arith.subf %0, %61 : vector<16x128xf32>
    %c3_15 = arith.constant 3 : index
    %63 = memref.load %arg2[%c3_15] : memref<4xf32, #tpu.memory_space<smem>>
    %64 = vector.broadcast %63 : f32 to vector<16x128xf32>
    %65 = arith.mulf %62, %64 : vector<16x128xf32>
    %c3_16 = arith.constant 3 : index
    %66 = memref.load %arg3[%c3_16] : memref<4xf32, #tpu.memory_space<smem>>
    %67 = math.erf %65 : vector<16x128xf32>
    %68 = vector.broadcast %66 : f32 to vector<16x128xf32>
    %69 = arith.mulf %68, %67 : vector<16x128xf32>
    %70 = arith.addf %51, %69 : vector<16x128xf32>
    %c3_17 = arith.constant 3 : index
    %71 = memref.load %arg4[%c3_17] : memref<4xf32, #tpu.memory_space<smem>>
    %72 = arith.mulf %65, %65 : vector<16x128xf32>
    %cst_18 = arith.constant 0.000000e+00 : f32
    %73 = vector.broadcast %cst_18 : f32 to vector<16x128xf32>
    %74 = arith.subf %73, %72 : vector<16x128xf32>
    %75 = math.exp %74 : vector<16x128xf32>
    %76 = vector.broadcast %71 : f32 to vector<16x128xf32>
    %77 = arith.mulf %76, %75 : vector<16x128xf32>
    %78 = arith.addf %59, %77 : vector<16x128xf32>
    %cst_19 = arith.constant 5.000000e-01 : f32
    %79 = vector.broadcast %cst_19 : f32 to vector<16x128xf32>
    %80 = arith.addf %70, %79 : vector<16x128xf32>
    %c0_20 = arith.constant 0 : index
    %c0_21 = arith.constant 0 : index
    %81 = vector.load %arg6[%c0_20, %c0_21] : memref<16x128xf32, #tpu.memory_space<vmem>>, vector<16x128xf32>
    tpu.vector_store %arg6[%c0_20, %c0_21], %80 {strides = array<i32>} : memref<16x128xf32, #tpu.memory_space<vmem>>, vector<16x128xf32>,
    %c0_22 = arith.constant 0 : index
    %c0_23 = arith.constant 0 : index
    %82 = vector.load %arg7[%c0_22, %c0_23] : memref<16x128xf32, #tpu.memory_space<vmem>>, vector<16x128xf32>
    tpu.vector_store %arg7[%c0_22, %c0_23], %78 {strides = array<i32>} : memref<16x128xf32, #tpu.memory_space<vmem>>, vector<16x128xf32>,
    return
  }
  func.func @transform_0(%arg0: i32) -> i32 {
    %c0_i32 = arith.constant 0 : i32
    %c0_i32_0 = arith.constant 0 : i32
    return %c0_i32 : i32
  }
  func.func @transform_1(%arg0: i32) -> i32 {
    %c0_i32 = arith.constant 0 : i32
    %c0_i32_0 = arith.constant 0 : i32
    return %c0_i32 : i32
  }
  func.func @transform_2(%arg0: i32) -> i32 {
    %c0_i32 = arith.constant 0 : i32
    %c0_i32_0 = arith.constant 0 : i32
    return %c0_i32 : i32
  }
  func.func @transform_3(%arg0: i32) -> i32 {
    %c0_i32 = arith.constant 0 : i32
    %c0_i32_0 = arith.constant 0 : i32
    return %c0_i32 : i32
  }
  func.func @transform_4(%arg0: i32) -> (i32, i32) {
    %c0_i32 = arith.constant 0 : i32
    %c0_i32_0 = arith.constant 0 : i32
    return %arg0, %c0_i32 : i32, i32
  }
  func.func @transform_5(%arg0: i32) -> (i32, i32) {
    %c0_i32 = arith.constant 0 : i32
    %c0_i32_0 = arith.constant 0 : i32
    return %arg0, %c0_i32 : i32, i32
  }
  func.func @transform_6(%arg0: i32) -> (i32, i32) {
    %c0_i32 = arith.constant 0 : i32
    %c0_i32_0 = arith.constant 0 : i32
    return %arg0, %c0_i32 : i32, i32
  }
}

</mosaic_0001>

<bundles_post_ra>
// kernel: tpu_custom_call.1
= control target key start
LH: loop header
LB: loop body
LE: loop exit
PB: predicated region body
PF: predicated region fallthrough
CT: control target
= control target key end

     0   :  { %12 = vsyncpa [#allocation5], 0  ;;  %s518_s0 = inlined_call_operand.hbm [shape: f32[4], index: 0, kind: input, shape index: {}]   ;;  %s519_s1 = inlined_call_operand.vmem [shape: f32[4], index: 1, kind: input, shape index: {}]   ;;  %s520_s2 = inlined_call_operand.vmem [shape: f32[4], index: 2, kind: input, shape index: {}]   ;;  %s521_s3 = inlined_call_operand.vmem [shape: f32[4], index: 3, kind: input, shape index: {}]   ;;  %s522_s4 = inlined_call_operand.hbm [shape: f32[16,128], index: 4, kind: input, shape index: {}]   ;;  %s523_s5 = inlined_call_operand.hbm [shape: f32[16,128], index: 5, kind: output, shape index: {0}]   ;;  %s524_s6 = inlined_call_operand.hbm [shape: f32[16,128], index: 6, kind: output, shape index: {1}]  }
   0x1   :  { %13 = vsyncpa [#allocation6], 0 }
   0x2   :  { %14 = vsyncpa [#allocation9], 0 }
   0x3   :  { %15 = vsyncpa [#allocation3], 0 }
   0x4   :  { %16 = vsyncpa [#allocation4], 0  ;;  %s42_s23 = sshll.u32 %s520_s2, 4  ;;  %s43_s23 = int_to_ptr.vmem [resolvable:$true] %s42_s23 }
   0x5   :  { %17 = vsyncpa [#allocation14], 0  ;;  %s301_s24 = scalar_lea.vmem %s43_s23, 16  ;;  %p306_p1 = scmp.lt.s32.totalorder %s43_s23, %s43_s23 }
   0x6   :  { %p302_p0 = scmp.ne.s32.totalorder %s43_s23, %s301_s24  ;;  %p307_p2 = scmp.lt.s32.totalorder %s301_s24, %s301_s24 }
   0x8   :  { %p308_p3 = por %p307_p2, %p306_p1 }
   0xa   :  { %p309_p4 = pnand %p308_p3, %p302_p0 }
   0xc   :  { %312 = shalt.err (!%p309_p4)
}
   0xd   :  { %s417_s25 = smov [#allocation8]   ;;  %s418_s26 = smov [#allocation2]  }
   0xe   :  { %45 = dma.vmem_to_smem %s43_s23, 16, %s417_s25, [#allocation9]  }
   0xf   :  { %25 = dma.hbm_to_smem %s518_s0, 16, %s418_s26, [#allocation5]  }
  0x10   :  { %s32_s2 = sshll.u32 %s519_s1, 4  ;;  %s52_s9 = sshll.u32 %s521_s3, 4  ;;  %s33_s2 = int_to_ptr.vmem [resolvable:$true] %s32_s2  ;;  %s53_s9 = int_to_ptr.vmem [resolvable:$true] %s52_s9 }
  0x11   :  { %s321_s10 = scalar_lea.vmem %s33_s2, 16  ;;  %p326_p6 = scmp.lt.s32.totalorder %s33_s2, %s33_s2 }
  0x12   :  { %p322_p5 = scmp.ne.s32.totalorder %s33_s2, %s321_s10  ;;  %p327_p7 = scmp.lt.s32.totalorder %s321_s10, %s321_s10 }
  0x14   :  { %p328_p8 = por %p327_p7, %p326_p6 }
  0x16   :  { %p329_p9 = pnand %p328_p8, %p322_p5 }
  0x18   :  { %332 = shalt.err (!%p329_p9)
}
  0x19   :  { %s419_s11 = smov [#allocation7]   ;;  %s333_s0 = scalar_lea.vmem %s53_s9, 16 }
  0x1a   :  { %35 = dma.vmem_to_smem %s33_s2, 16, %s419_s11, [#allocation6]  }
  0x1b   :  { %p334_p10 = scmp.ne.s32.totalorder %s53_s9, %s333_s0  ;;  %p338_p11 = scmp.lt.s32.totalorder %s53_s9, %s53_s9 }
  0x1c   :  { %p339_p12 = scmp.lt.s32.totalorder %s333_s0, %s333_s0 }
  0x1e   :  { %p340_p13 = por %p339_p12, %p338_p11 }
  0x20   :  { %p341_p0 = pnand %p340_p13, %p334_p10 }
  0x22   :  { %344 = shalt.err (!%p341_p0)
}
  0x23   :  { %s420_s1 = smov [#allocation10]   ;;  %s421_s3 = smov [#allocation11]  }
  0x24   :  { %55 = dma.vmem_to_smem %s53_s9, 16, %s420_s1, [#allocation9]  }
  0x25   :  { %s61_s12 = sshll.u32 %s421_s3, 4  ;;  %s62_s12 = int_to_ptr.vmem [resolvable:$true] %s61_s12 }
  0x26   :  { %s353_s13 = scalar_lea.vmem %s62_s12, 256  ;;  %p358_p2 = scmp.lt.s32.totalorder %s62_s12, %s62_s12 }
  0x27   :  { %p354_p1 = scmp.ne.s32.totalorder %s62_s12, %s353_s13  ;;  %p359_p3 = scmp.lt.s32.totalorder %s353_s13, %s353_s13 }
  0x29   :  { %p360_p4 = por %p359_p3, %p358_p2 }
  0x2b   :  { %p361_p5 = pnand %p360_p4, %p354_p1 }
  0x2d   :  { %364 = shalt.err (!%p361_p5)
}
  0x2e   :  { %s422_s14 = smov 128   ;;  %s423_s15 = smov 8  }
  0x2f   :  { %67 = dma.hbm_to_vmem [thread:$0]  %s522_s4, 256, %s62_s12, [#allocation3], %s422_s14, %s422_s14, %s423_s15  }
  0x30   :  { %405 = dma.done.wait [#allocation5], 16  }
  0x31   :  { %406 = vsyncadd [#allocation5], 4294967280 }
  0x32   :  { %407 = dma.done.wait [#allocation6], 16  }
  0x33   :  { %408 = vsyncadd [#allocation6], 4294967280 }
  0x34   :  { %409 = dma.done.wait [#allocation9], 32  }
  0x35   :  { %410 = vsyncadd [#allocation9], 4294967264 }
  0x36   :  { %411 = dma.done.wait [#allocation3], 256  }
  0x37   :  { %412 = vsyncadd [#allocation3], 4294967040 }
  0x38   :  { %83 = sfence }
  0x39   :  { %s86_s18 = sld [smem:[#allocation2]]  ;;  %v84_v0 = vld [vmem:[#allocation11] sm:$0xff]  ;;  %v85_v1 = vld [vmem:[#allocation11 + $0x8] sm:$0xff]  ;;  %s424_s8 = smov [#allocation12]  }
  0x3a   :  { %s90_s19 = sld [smem:[#allocation7]]  ;;  %s217_s9 = sshll.u32 %s424_s8, 4  ;;  %s218_s9 = int_to_ptr.vmem [resolvable:$true] %s217_s9 }
  0x3b   :  { %s248_s20 = sld [smem:[#allocation2 + $0x1]]  ;;  %s365_s10 = scalar_lea.vmem %s218_s9, 256 }
  0x3c   :  { %s249_s21 = sld [smem:[#allocation7 + $0x1]]  ;;  %p366_p6 = scmp.ne.s32.totalorder %s218_s9, %s365_s10 }
  0x3d   :  { %s252_s22 = sld [smem:[#allocation2 + $0x2]]  ;;  %p370_p7 = scmp.lt.s32.totalorder %s218_s9, %s218_s9 }
  0x3e   :  { %s253_s4 = sld [smem:[#allocation7 + $0x2]]  ;;  %p371_p8 = scmp.lt.s32.totalorder %s365_s10, %s365_s10 }
  0x3f   :  { %v87_v2 = vstv %s86_s18  ;;  %s256_s23 = sld [smem:[#allocation2 + $0x3]] }
  0x40   :  { %v88_v3 = vsub.f32 %v84_v0, %v87_v2  ;;  %v91_v4 = vstv %s90_s19  ;;  %v89_v5 = vsub.f32 %v85_v1, %v87_v2  ;;  %s479_s24 = sld [smem:[#allocation7 + $0x3]]  ;;  %p372_p9 = por %p371_p8, %p370_p7 }
  0x41   :  { %v117_v7 = vstv %s248_s20  ;;  %s481_s25 = sld [smem:[#allocation8]] }
  0x42   :  { %v92_v6 = vmul.f32 %v91_v4, %v88_v3  ;;  %v93_v8 = vmul.f32 %v91_v4, %v89_v5  ;;  %v118_v9 = vsub.f32 %v84_v0, %v117_v7  ;;  %v121_v10 = vstv %s249_s21  ;;  %s484_s26 = sld [smem:[#allocation8 + $0x1]]  ;;  %p373_p10 = pnand %p372_p9, %p366_p6 }
  0x43   :  { %v119_v11 = vsub.f32 %v85_v1, %v117_v7  ;;  %v147_v15 = vstv %s252_s22  ;;  %s486_s27 = sld [smem:[#allocation8 + $0x2]] }
  0x44   :  { %269 = verf.f32 %v92_v6  ;;  %v103_v12 = vmul.f32 %v92_v6, %v92_v6  ;;  %v104_v13 = vmul.f32 %v93_v8, %v93_v8  ;;  %v122_v14 = vmul.f32 %v121_v10, %v118_v9  ;;  %s488_s28 = sld [smem:[#allocation8 + $0x3]] }
  0x45   :  { %271 = verf.f32 %v93_v8  ;;  %v123_v16 = vmul.f32 %v121_v10, %v119_v11  ;;  %v148_v17 = vsub.f32 %v84_v0, %v147_v15  ;;  %v151_v18 = vstv %s253_s4  ;;  %s491_s29 = sld [smem:[#allocation10]] }
  0x46   :  { %v149_v19 = vsub.f32 %v85_v1, %v147_v15  ;;  %v105_v20 = vsub.f32 0.0, %v103_v12  ;;  %273 = verf.f32 %v122_v14  ;;  %v133_v21 = vmul.f32 %v122_v14, %v122_v14  ;;  %s494_s30 = sld [smem:[#allocation10 + $0x1]] }
  0x47   :  { %v106_v22 = vsub.f32 0.0, %v104_v13  ;;  %v152_v23 = vmul.f32 %v151_v18, %v148_v17  ;;  %v177_v24 = vstv %s256_s23  ;;  %275 = verf.f32 %v123_v16  ;;  %s496_s2 = sld [smem:[#allocation10 + $0x2]] }
  0x48   :  { %v153_v25 = vmul.f32 %v151_v18, %v149_v19  ;;  %v178_v26 = vsub.f32 %v84_v0, %v177_v24  ;;  %v181_v27 = vstv %s479_s24  ;;  %v179_v28 = vsub.f32 %v85_v1, %v177_v24  ;;  %s499_s7 = sld [smem:[#allocation10 + $0x3]] }
  0x49   :  { %v107_v29 = vmul.f32 1.442695, %v105_v20  ;;  %277 = verf.f32 %v152_v23  ;;  %v135_v30 = vsub.f32 0.0, %v133_v21  ;;  %v163_v31 = vmul.f32 %v152_v23, %v152_v23 }
  0x4a   :  { %v182_v32 = vmul.f32 %v181_v27, %v178_v26  ;;  %279 = verf.f32 %v153_v25  ;;  %v183_v33 = vmul.f32 %v181_v27, %v179_v28  ;;  %v109_v37 = vmul.f32 1.442695, %v106_v22 }
  0x4b   :  { %281 = vpow2.f32 %v107_v29  ;;  %v137_v34 = vmul.f32 1.442695, %v135_v30  ;;  %v165_v35 = vsub.f32 0.0, %v163_v31  ;;  %v134_v39 = vmul.f32 %v123_v16, %v123_v16 }
  0x4c   :  { %283 = verf.f32 %v182_v32  ;;  %v193_v36 = vmul.f32 %v182_v32, %v182_v32  ;;  %v164_v41 = vmul.f32 %v153_v25, %v153_v25  ;;  %v194_v42 = vmul.f32 %v183_v33, %v183_v33 }
  0x4d   :  { %285 = verf.f32 %v183_v33  ;;  %v167_v38 = vmul.f32 1.442695, %v165_v35  ;;  %v97_v43 = vstv %s481_s25  ;;  %v136_v44 = vsub.f32 0.0, %v134_v39 }
  0x4e   :  { %287 = vpow2.f32 %v137_v34  ;;  %v195_v40 = vsub.f32 0.0, %v193_v36  ;;  %v166_v47 = vsub.f32 0.0, %v164_v41  ;;  %v196_v48 = vsub.f32 0.0, %v194_v42 }
  0x4f   :  { %289 = vpow2.f32 %v167_v38  ;;  %v127_v50 = vstv %s484_s26  ;;  %v139_v51 = vmul.f32 1.442695, %v136_v44  ;;  %v157_v59 = vstv %s486_s27 }
  0x50   :  { %v197_v46 = vmul.f32 1.442695, %v195_v40  ;;  %291 = vpow2.f32 %v109_v37  ;;  %v169_v53 = vmul.f32 1.442695, %v166_v47  ;;  %v199_v54 = vmul.f32 1.442695, %v196_v48 }
  0x51   :  { %v270_v45 = vpop.eup %269  ;;  %v187_v1 = vstv %s488_s28  ;;  %v111_v3 = vstv %s491_s29  ;;  %v141_v8 = vstv %s494_s30  ;;  %v171_v13 = vstv %s496_s2 }
  0x52   :  { %v272_v49 = vpop.eup %271  ;;  %v98_v52 = vmul.f32 %v270_v45, %v97_v43  ;;  %293 = vpow2.f32 %v197_v46  ;;  %v201_v22 = vstv %s499_s7 }
  0x53   :  { %v274_v55 = vpop.eup %273  ;;  %v99_v56 = vmul.f32 %v272_v49, %v97_v43  ;;  %295 = vpow2.f32 %v139_v51 }
  0x54   :  { %v276_v57 = vpop.eup %275  ;;  %v128_v58 = vmul.f32 %v274_v55, %v127_v50  ;;  %297 = vpow2.f32 %v169_v53 }
  0x55   :  { %v129_v60 = vmul.f32 %v276_v57, %v127_v50  ;;  %299 = vpow2.f32 %v199_v54 }
  0x56   :  { %v278_v61 = vpop.eup %277  ;;  %v130_v62 = vadd.f32 %v128_v58, %v98_v52 }
  0x57   :  { %v280_v63 = vpop.eup %279  ;;  %v158_v0 = vmul.f32 %v278_v61, %v157_v59  ;;  %v131_v2 = vadd.f32 %v129_v60, %v99_v56 }
  0x58   :  { %v282_v4 = vpop.eup %281  ;;  %v159_v5 = vmul.f32 %v280_v63, %v157_v59 }
  0x59   :  { %v284_v6 = vpop.eup %283  ;;  %v160_v7 = vadd.f32 %v158_v0, %v130_v62  ;;  %v112_v12 = vmul.f32 %v282_v4, %v111_v3 }
  0x5a   :  { %v286_v9 = vpop.eup %285  ;;  %v188_v10 = vmul.f32 %v284_v6, %v187_v1  ;;  %v161_v11 = vadd.f32 %v159_v5, %v131_v2 }
  0x5b   :  { %v288_v14 = vpop.eup %287  ;;  %v189_v15 = vmul.f32 %v286_v9, %v187_v1 }
  0x5c   :  { %v290_v16 = vpop.eup %289  ;;  %v190_v17 = vadd.f32 %v188_v10, %v160_v7  ;;  %v142_v18 = vmul.f32 %v288_v14, %v141_v8 }
  0x5d   :  { %v292_v19 = vpop.eup %291  ;;  %v191_v20 = vadd.f32 %v189_v15, %v161_v11  ;;  %v172_v21 = vmul.f32 %v290_v16, %v171_v13 }
  0x5e   :  { %v206_v23 = vadd.f32 0.5, %v190_v17  ;;  %v144_v24 = vadd.f32 %v142_v18, %v112_v12  ;;  %v113_v27 = vmul.f32 %v292_v19, %v111_v3 }
  0x5f   :  { %v294_v25 = vpop.eup %293  ;;  %v207_v26 = vadd.f32 0.5, %v191_v20 }
  0x60   :  { %v296_v28 = vpop.eup %295  ;;  %208 = vst [vmem:[#allocation12] sm:$0xff] %v206_v23  ;;  %v174_v29 = vadd.f32 %v172_v21, %v144_v24  ;;  %v202_v30 = vmul.f32 %v294_v25, %v201_v22 }
  0x61   :  { %v298_v31 = vpop.eup %297  ;;  %209 = vst [vmem:[#allocation12 + $0x8] sm:$0xff] %v207_v26  ;;  %v143_v32 = vmul.f32 %v296_v28, %v141_v8 }
  0x62   :  { %v300_v33 = vpop.eup %299  ;;  %v204_v34 = vadd.f32 %v202_v30, %v174_v29  ;;  %v173_v35 = vmul.f32 %v298_v31, %v171_v13 }
  0x63   :  { %376 = shalt.err (!%p373_p10)
}
  0x64   :  { %223 = dma.vmem_to_hbm [thread:$0]  %s218_s9, 256, %s523_s5, [#allocation4], %s422_s14, %s422_s14, %s423_s15   ;;  %v145_v36 = vadd.f32 %v143_v32, %v113_v27  ;;  %v203_v37 = vmul.f32 %v300_v33, %v201_v22  ;;  %210 = vst [vmem:[#allocation13] sm:$0xff] %v204_v34 }
  0x65   :  { %s425_s1 = smov [#allocation13]  }
  0x66   :  { %s229_s3 = sshll.u32 %s425_s1, 4  ;;  %v175_v38 = vadd.f32 %v173_v35, %v145_v36  ;;  %s230_s3 = int_to_ptr.vmem [resolvable:$true] %s229_s3 }
  0x67   :  { %s385_s12 = scalar_lea.vmem %s230_s3, 256  ;;  %p390_p12 = scmp.lt.s32.totalorder %s230_s3, %s230_s3 }
  0x68   :  { %v205_v39 = vadd.f32 %v203_v37, %v175_v38  ;;  %p386_p11 = scmp.ne.s32.totalorder %s230_s3, %s385_s12  ;;  %p391_p13 = scmp.lt.s32.totalorder %s385_s12, %s385_s12 }
  0x6a   :  { %211 = vst [vmem:[#allocation13 + $0x8] sm:$0xff] %v205_v39  ;;  %p392_p0 = por %p391_p13, %p390_p12 }
  0x6c   :  { %p393_p1 = pnand %p392_p0, %p386_p11 }
  0x6e   :  { %396 = shalt.err (!%p393_p1)
}
  0x6f   :  { %235 = dma.vmem_to_hbm [thread:$0]  %s230_s3, 256, %s524_s6, [#allocation14], %s422_s14, %s422_s14, %s423_s15  }
  0x70   :  { %413 = dma.done.wait [#allocation4], 256  }
  0x71   :  { %414 = vsyncadd [#allocation4], 4294967040 }
  0x72   :  { %415 = dma.done.wait [#allocation14], 256  }
  0x73   :  { %416 = vsyncadd [#allocation14], 4294967040 }
  0x74   :  { %242 = vsyncpa [#allocation3], 1 }
  0x75   :  { %243 = vsyncpa [#allocation4], 1 }
  0x76   :  { %244 = vsyncpa [#allocation14], 1 }
  0x77   :  { %245 = vsyncpa [#allocation5], 1 }
  0x78   :  { %246 = vsyncpa [#allocation6], 1 }
  0x79   :  { %247 = vsyncpa [#allocation9], 1 }

</bundles_post_ra>
